<compile_context>
chip_gen: v6e
topology: v6e:2x2x1
jax: 0.10.0
libtpu: 0.0.40
codegen_flags: <defaults>
</compile_context>

<pallas_src>
import functools

import jax
import jax.numpy as jnp
from jax.experimental import pallas as pl
from jax.experimental.pallas import tpu as pltpu

_LANE = 128


def _linear_kernel(x_ref, w_ref, b_ref, o_ref):
    """No-dropout path:  o = x @ W_pad + b_pad   (all f32, lane-dense output)."""
    o_ref[...] = (
        jnp.dot(x_ref[...], w_ref[...], preferred_element_type=jnp.float32)
        + b_ref[...]
    )


def _dropout_linear_kernel(x_ref, bits_ref, w_ref, b_ref, o_ref, *, threshold):
    """Dropout + linear.

    x_ref:    [tb, H]  f32
    bits_ref: [tb, H]  uint32 random bits
    w_ref:    [H, Npad] f32  (already transposed, scaled by 1/(1-p), zero-padded)
    b_ref:    [1, Npad] f32
    o_ref:    [tb, Npad] f32
    keep element iff bits >= threshold, i.e. with probability 1 - p.
    """
    keep = bits_ref[...] >= jnp.uint32(threshold)
    x = jnp.where(keep, x_ref[...], jnp.float32(0.0))
    o_ref[...] = (
        jnp.dot(x, w_ref[...], preferred_element_type=jnp.float32) + b_ref[...]
    )


def _pad_cols(a, cols):
    """Zero-pad the last dim of a 2-D array up to `cols`."""
    r, c = a.shape
    if c == cols:
        return a
    return jnp.zeros((r, cols), dtype=a.dtype).at[:, :c].set(a)


def docscan_forward(feature, weight, bias, *, dropout=None, dropout_key=None):
    """DocScanModel.forward.

    feature: [B, H] f32
    weight:  [N, H] f32  (torch nn.Linear layout)
    bias:    [N]    f32
    dropout: None or float p in [0, 1)
    dropout_key: jax PRNG key, required when dropout is active (training mode).
    Returns: [B, N] f32
    """
    feature = feature.astype(jnp.float32)
    B, H = feature.shape
    N, H2 = weight.shape
    assert H == H2, (H, H2)

    n_pad = ((N + _LANE - 1) // _LANE) * _LANE  # lane-dense output width

    # Pre-transpose / pad weight & bias once, and fold the 1/(1-p) dropout scale
    # into the weight so the kernel does zero extra elementwise work.
    use_dropout = dropout is not None and float(dropout) > 0.0
    w_t = weight.astype(jnp.float32).T  # [H, N]
    if use_dropout:
        w_t = w_t * jnp.float32(1.0 / (1.0 - float(dropout)))
    w_pad = _pad_cols(w_t, n_pad)                                   # [H, Npad]
    b_pad = _pad_cols(bias.astype(jnp.float32).reshape(1, N), n_pad)  # [1, Npad]

    # Batch tiling: 512-row blocks if B allows it, else a single whole-B block.
    # (For tiny B this is one grid point -> no pointless multi-core split.)
    tile_b = 512 if (B >= 512 and B % 512 == 0) else B
    grid = (B // tile_b,)

    x_spec = pl.BlockSpec((tile_b, H), lambda i: (i, 0))
    w_spec = pl.BlockSpec((H, n_pad), lambda i: (0, 0))   # weight resident across tiles
    b_spec = pl.BlockSpec((1, n_pad), lambda i: (0, 0))
    o_spec = pl.BlockSpec((tile_b, n_pad), lambda i: (i, 0))
    out_shape = jax.ShapeDtypeStruct((B, n_pad), jnp.float32)
    cparams = pltpu.CompilerParams(dimension_semantics=("parallel",))

    if use_dropout:
        if dropout_key is None:
            raise ValueError("dropout_key is required when dropout is enabled")
        # keep prob = 1 - p  <=>  keep iff bits >= floor(p * 2**32)
        threshold = int(float(dropout) * float(1 << 32))
        bits = jax.random.bits(dropout_key, (B, H), dtype=jnp.uint32)
        kernel = functools.partial(_dropout_linear_kernel, threshold=threshold)
        out_pad = pl.pallas_call(
            kernel,
            out_shape=out_shape,
            grid=grid,
            in_specs=[x_spec, x_spec, w_spec, b_spec],
            out_specs=o_spec,
            compiler_params=cparams,
        )(feature, bits, w_pad, b_pad)
    else:
        out_pad = pl.pallas_call(
            _linear_kernel,
            out_shape=out_shape,
            grid=grid,
            in_specs=[x_spec, w_spec, b_spec],
            out_specs=o_spec,
            compiler_params=cparams,
        )(feature, w_pad, b_pad)

    return out_pad[:, :N]


if __name__ == "__main__":
    # Small shapes consistent with the module: batch=8, hidden_dim=128, num_labels=16.
    B, H, N = 8, 128, 16
    dropout_p = 0.1

    key = jax.random.PRNGKey(0)
    k_x, k_w, k_b, k_drop = jax.random.split(key, 4)

    feature = jax.random.normal(k_x, (B, H), dtype=jnp.float32)

    # Deterministic Linear init (uniform in [-1/sqrt(H), 1/sqrt(H)], like torch).
    bound = 1.0 / float(jnp.sqrt(jnp.float32(H)))
    weight = jax.random.uniform(k_w, (N, H), minval=-bound, maxval=bound,
                                dtype=jnp.float32)  # torch layout [N, H]
    bias = jax.random.uniform(k_b, (N,), minval=-bound, maxval=bound,
                              dtype=jnp.float32)

    # Training-mode forward with dropout.
    out = docscan_forward(feature, weight, bias, dropout=dropout_p,
                          dropout_key=k_drop)
    out = jax.block_until_ready(out)
    assert out.shape == (B, N) and out.dtype == jnp.float32
    assert bool(jnp.all(jnp.isfinite(out)))

    # Sanity check against plain-JAX reference with dropout disabled
    # (dropout path uses a different bit stream than torch's RNG, so it cannot
    #  be bit-compared; the no-dropout path must match the Linear exactly).
    out_nodrop = jax.block_until_ready(
        docscan_forward(feature, weight, bias, dropout=None))
    ref = feature @ weight.T + bias[None, :]
    assert jnp.allclose(out_nodrop, ref, atol=1e-5, rtol=1e-5)

    # Dropout-path sanity: masking feature with the same bits/threshold and
    # scaling by 1/(1-p) must reproduce the kernel output exactly.
    bits = jax.random.bits(k_drop, (B, H), dtype=jnp.uint32)
    thr = jnp.uint32(int(dropout_p * float(1 << 32)))
    feat_drop = jnp.where(bits >= thr, feature, 0.0) / (1.0 - dropout_p)
    ref_drop = feat_drop @ weight.T + bias[None, :]
    assert jnp.allclose(out, ref_drop, atol=1e-4, rtol=1e-4)

    print("KERNEL_OK")
</pallas_src>

<mosaic_0001>
module attributes {stable_mosaic.version = 11 : i64} {
  func.func @_dropout_linear_kernel(%arg0: i32, %arg1: memref<8x128xf32, #tpu.memory_space<vmem>>, %arg2: memref<8x128xi32, #tpu.memory_space<vmem>>, %arg3: memref<128x128xf32, #tpu.memory_space<vmem>>, %arg4: memref<1x128xf32, #tpu.memory_space<vmem>>, %arg5: memref<8x128xf32, #tpu.memory_space<vmem>>) attributes {dimension_semantics = [#tpu.dimension_semantics<parallel>], iteration_bounds = array<i64: 1>, scalar_prefetch = 0 : i64, scratch_operands = 0 : i64, tpu.core_type = #tpu.core_type<tc>, window_params = [{transform_indices = @transform_0, window_bounds = array<i64: 8, 128>}, {transform_indices = @transform_1, window_bounds = array<i64: 8, 128>}, {pipeline_mode = #tpu.pipeline_mode<synchronous>, transform_indices = @transform_2, window_bounds = array<i64: 128, 128>}, {pipeline_mode = #tpu.pipeline_mode<synchronous>, transform_indices = @transform_3, window_bounds = array<i64: 1, 128>}, {transform_indices = @transform_4, window_bounds = array<i64: 8, 128>}]} {
    %c0 = arith.constant 0 : index
    %c0_0 = arith.constant 0 : index
    %0 = vector.load %arg2[%c0, %c0_0] : memref<8x128xi32, #tpu.memory_space<vmem>>, vector<8x128xi32>
    %c429496729_i32 = arith.constant 429496729 : i32
    %1 = vector.broadcast %c429496729_i32 : i32 to vector<8x128xi32>
    %2 = arith.cmpi uge, %0, %1 : vector<8x128xi32>
    %c0_1 = arith.constant 0 : index
    %c0_2 = arith.constant 0 : index
    %3 = vector.load %arg1[%c0_1, %c0_2] : memref<8x128xf32, #tpu.memory_space<vmem>>, vector<8x128xf32>
    %cst = arith.constant 0.000000e+00 : f32
    %4 = vector.broadcast %cst : f32 to vector<8x128xf32>
    %5 = arith.select %2, %3, %4 : vector<8x128xi1>, vector<8x128xf32>
    %c0_3 = arith.constant 0 : index
    %c0_4 = arith.constant 0 : index
    %6 = vector.load %arg3[%c0_3, %c0_4] : memref<128x128xf32, #tpu.memory_space<vmem>>, vector<128x128xf32>
    %cst_5 = arith.constant dense<0.000000e+00> : vector<8x128xf32>
    %7 = tpu.matmul %5, %6, %cst_5 {dimension_numbers = #tpu.dot_dimension_numbers<[1], [0], [0], [1], [0, 0, 1, 1], [], []>} : vector<8x128xf32>, vector<128x128xf32>, vector<8x128xf32> -> vector<8x128xf32>
    %c0_6 = arith.constant 0 : index
    %c0_7 = arith.constant 0 : index
    %8 = vector.load %arg4[%c0_6, %c0_7] : memref<1x128xf32, #tpu.memory_space<vmem>>, vector<1x128xf32>
    %9 = vector.broadcast %8 : vector<1x128xf32> to vector<8x128xf32>
    %10 = arith.addf %7, %9 : vector<8x128xf32>
    %c0_8 = arith.constant 0 : index
    %c0_9 = arith.constant 0 : index
    %11 = vector.load %arg5[%c0_8, %c0_9] : memref<8x128xf32, #tpu.memory_space<vmem>>, vector<8x128xf32>
    tpu.vector_store %arg5[%c0_8, %c0_9], %10 {strides = array<i32>} : memref<8x128xf32, #tpu.memory_space<vmem>>, vector<8x128xf32>,
    return
  }
  func.func @transform_0(%arg0: i32) -> (i32, i32) {
    %c0_i32 = arith.constant 0 : i32
    %c0_i32_0 = arith.constant 0 : i32
    return %arg0, %c0_i32 : i32, i32
  }
  func.func @transform_1(%arg0: i32) -> (i32, i32) {
    %c0_i32 = arith.constant 0 : i32
    %c0_i32_0 = arith.constant 0 : i32
    return %arg0, %c0_i32 : i32, i32
  }
  func.func @transform_2(%arg0: i32) -> (i32, i32) {
    %c0_i32 = arith.constant 0 : i32
    %c0_i32_0 = arith.constant 0 : i32
    %c0_i32_1 = arith.constant 0 : i32
    return %c0_i32, %c0_i32_0 : i32, i32
  }
  func.func @transform_3(%arg0: i32) -> (i32, i32) {
    %c0_i32 = arith.constant 0 : i32
    %c0_i32_0 = arith.constant 0 : i32
    %c0_i32_1 = arith.constant 0 : i32
    return %c0_i32, %c0_i32_0 : i32, i32
  }
  func.func @transform_4(%arg0: i32) -> (i32, i32) {
    %c0_i32 = arith.constant 0 : i32
    %c0_i32_0 = arith.constant 0 : i32
    return %arg0, %c0_i32 : i32, i32
  }
}

</mosaic_0001>

<bundles_post_ra>
// kernel: tpu_custom_call.1
= control target key start
LH: loop header
LB: loop body
LE: loop exit
PB: predicated region body
PF: predicated region fallthrough
CT: control target
= control target key end

     0   :  { %9 = vsyncpa [#allocation3], 0  ;;  %s365_s0 = inlined_call_operand.hbm [shape: f32[8,128], index: 0, kind: input, shape index: {}]   ;;  %s366_s1 = inlined_call_operand.hbm [shape: u32[8,128], index: 1, kind: input, shape index: {}]   ;;  %s367_s2 = inlined_call_operand.hbm [shape: f32[128,128], index: 2, kind: input, shape index: {}]   ;;  %s368_s3 = inlined_call_operand.vmem [shape: f32[1,128], index: 3, kind: input, shape index: {}]   ;;  %s369_s4 = inlined_call_operand.hbm [shape: f32[8,128], index: 4, kind: output, shape index: {}]  }
   0x1   :  { %10 = vsyncpa [#allocation6], 0 }
   0x2   :  { %11 = vsyncpa [#allocation4], 0  ;;  %s317_s15 = smov [#allocation5]   ;;  %s318_s17 = smov [#allocation2]  }
   0x3   :  { %s28_s16 = sshll.u32 %s317_s15, 4  ;;  %s18_s18 = sshll.u32 %s318_s17, 4  ;;  %s29_s16 = int_to_ptr.vmem [resolvable:$true] %s28_s16  ;;  %s19_s18 = int_to_ptr.vmem [resolvable:$true] %s18_s18 }
   0x4   :  { %s239_s19 = scalar_lea.vmem %s29_s16, 128  ;;  %p244_p1 = scmp.lt.s32.totalorder %s29_s16, %s29_s16 }
   0x5   :  { %p240_p0 = scmp.ne.s32.totalorder %s29_s16, %s239_s19  ;;  %p245_p2 = scmp.lt.s32.totalorder %s239_s19, %s239_s19 }
   0x7   :  { %p246_p3 = por %p245_p2, %p244_p1 }
   0x9   :  { %p247_p4 = pnand %p246_p3, %p240_p0 }
   0xb   :  { %250 = shalt.err (!%p247_p4)
}
   0xc   :  { %31 = dma.hbm_to_vmem [thread:$0]  %s366_s1, 128, %s29_s16, [#allocation6]  }
   0xd   :  { %s259_s22 = scalar_lea.vmem %s19_s18, 128  ;;  %p264_p6 = scmp.lt.s32.totalorder %s19_s18, %s19_s18 }
   0xe   :  { %p260_p5 = scmp.ne.s32.totalorder %s19_s18, %s259_s22  ;;  %p265_p7 = scmp.lt.s32.totalorder %s259_s22, %s259_s22 }
  0x10   :  { %p266_p8 = por %p265_p7, %p264_p6 }
  0x12   :  { %p267_p9 = pnand %p266_p8, %p260_p5 }
  0x14   :  { %270 = shalt.err (!%p267_p9)
}
  0x15   :  { %21 = dma.hbm_to_vmem [thread:$0]  %s365_s0, 128, %s19_s18, [#allocation3]  }
  0x16   :  { %s319_s25 = smov [#allocation7]  }
  0x17   :  { %s37_s26 = sshll.u32 %s319_s25, 4  ;;  %s38_s26 = int_to_ptr.vmem [resolvable:$true] %s37_s26 }
  0x18   :  { %s279_s27 = scalar_lea.vmem %s38_s26, 2048  ;;  %p284_p11 = scmp.lt.s32.totalorder %s38_s26, %s38_s26 }
  0x19   :  { %p280_p10 = scmp.ne.s32.totalorder %s38_s26, %s279_s27  ;;  %p285_p12 = scmp.lt.s32.totalorder %s279_s27, %s279_s27 }
  0x1b   :  { %p286_p13 = por %p285_p12, %p284_p11 }
  0x1d   :  { %p287_p0 = pnand %p286_p13, %p280_p10 }
  0x1f   :  { %290 = shalt.err (!%p287_p0)
}
  0x20   :  { %s320_s1 = smov 128   ;;  %s321_s28 = smov 8  }
  0x21   :  { %43 = dma.hbm_to_vmem [thread:$0]  %s367_s2, 2048, %s38_s26, [#allocation6], %s320_s1, %s320_s1, %s321_s28  }
  0x22   :  { %311 = dma.done.wait [#allocation3], 128  }
  0x23   :  { %312 = vsyncadd [#allocation3], 4294967168 }
  0x24   :  { %313 = dma.done.wait [#allocation6], 2176  }
  0x25   :  { %314 = vsyncadd [#allocation6], 4294965120  ;;  %v322_v0 = vmov 0.0   ;;  %vm323_vm0 = vmmov 0   ;;  %v74_v1 = vld [vmem:[#allocation7 + $0x78] sm:$0xff]  ;;  %v73_v2 = vld [vmem:[#allocation7 + $0x70] sm:$0xff] }
  0x26   :  { %188 = vmatprep.subr.mxu0 %v322_v0  ;;  %220 = vmatprep.mubr.msk.f32.mxu0 %vm323_vm0, %v322_v0  ;;  %v72_v3 = vld [vmem:[#allocation7 + $0x68] sm:$0xff]  ;;  %v71_v4 = vld [vmem:[#allocation7 + $0x60] sm:$0xff]  ;;  %v70_v5 = vld [vmem:[#allocation7 + $0x58] sm:$0xff]  ;;  %s324_s5 = smov [#allocation8]  }
  0x27   :  { %189 = vmatpush3.msra.mxu0 %v74_v1  ;;  %v69_v6 = vld [vmem:[#allocation7 + $0x50] sm:$0xff]  ;;  %v68_v7 = vld [vmem:[#allocation7 + $0x48] sm:$0xff]  ;;  %v67_v8 = vld [vmem:[#allocation7 + $0x40] sm:$0xff]  ;;  %s159_s6 = sshll.u32 %s324_s5, 4  ;;  %s160_s6 = int_to_ptr.vmem [resolvable:$true] %s159_s6 }
  0x28   :  { %190 = vmatprep.subr.mxu0 %v322_v0  ;;  %v66_v9 = vld [vmem:[#allocation7 + $0x38] sm:$0xff]  ;;  %v65_v10 = vld [vmem:[#allocation7 + $0x30] sm:$0xff]  ;;  %v64_v11 = vld [vmem:[#allocation7 + $0x28] sm:$0xff]  ;;  %s291_s7 = scalar_lea.vmem %s160_s6, 128  ;;  %p296_p2 = scmp.lt.s32.totalorder %s160_s6, %s160_s6 }
  0x29   :  { %191 = vmatpush3.msra.mxu0 %v73_v2  ;;  %v63_v12 = vld [vmem:[#allocation7 + $0x20] sm:$0xff]  ;;  %v62_v13 = vld [vmem:[#allocation7 + $0x18] sm:$0xff]  ;;  %v61_v14 = vld [vmem:[#allocation7 + $0x10] sm:$0xff]  ;;  %p292_p1 = scmp.ne.s32.totalorder %s160_s6, %s291_s7  ;;  %p297_p3 = scmp.lt.s32.totalorder %s291_s7, %s291_s7 }
  0x2a   :  { %192 = vmatprep.subr.mxu0 %v322_v0  ;;  %v60_v15 = vld [vmem:[#allocation7 + $0x8] sm:$0xff]  ;;  %v55_v16 = vld [vmem:[#allocation5] sm:$0xff]  ;;  %v59_v17 = vld [vmem:[#allocation7] sm:$0xff] }
  0x2b   :  { %193 = vmatpush3.msra.mxu0 %v72_v3  ;;  %vm56_vm1 = vcmp.ge.u32.totalorder %v55_v16, 429496729  ;;  %v57_v18 = vld [vmem:[#allocation2] sm:$0xff]  ;;  %p298_p4 = por %p297_p3, %p296_p2 }
  0x2c   :  { %194 = vmatprep.subr.mxu0 %v322_v0  ;;  %v169_v19 = vld [vmem:[%s368_s3] ss:$0 sm:$0xff] }
  0x2d   :  { %195 = vmatpush3.msra.mxu0 %v71_v4  ;;  %p299_p5 = pnand %p298_p4, %p292_p1 }
  0x2e   :  { %196 = vmatprep.subr.mxu0 %v322_v0 }
  0x2f   :  { %197 = vmatpush3.msra.mxu0 %v70_v5 }
  0x30   :  { %198 = vmatprep.subr.mxu0 %v322_v0 }
  0x31   :  { %199 = vmatpush3.msra.mxu0 %v69_v6 }
  0x32   :  { %200 = vmatprep.subr.mxu0 %v322_v0 }
  0x33   :  { %201 = vmatpush3.msra.mxu0 %v68_v7 }
  0x34   :  { %202 = vmatprep.subr.mxu0 %v322_v0 }
  0x35   :  { %203 = vmatpush3.msra.mxu0 %v67_v8 }
  0x36   :  { %204 = vmatprep.subr.mxu0 %v322_v0 }
  0x37   :  { %205 = vmatpush3.msra.mxu0 %v66_v9 }
  0x38   :  { %206 = vmatprep.subr.mxu0 %v322_v0 }
  0x39   :  { %207 = vmatpush3.msra.mxu0 %v65_v10 }
  0x3a   :  { %208 = vmatprep.subr.mxu0 %v322_v0 }
  0x3b   :  { %209 = vmatpush3.msra.mxu0 %v64_v11 }
  0x3c   :  { %210 = vmatprep.subr.mxu0 %v322_v0 }
  0x3d   :  { %211 = vmatpush3.msra.mxu0 %v63_v12 }
  0x3e   :  { %212 = vmatprep.subr.mxu0 %v322_v0 }
  0x3f   :  { %213 = vmatpush3.msra.mxu0 %v62_v13 }
  0x40   :  { %214 = vmatprep.subr.mxu0 %v322_v0 }
  0x41   :  { %215 = vmatpush3.msra.mxu0 %v61_v14 }
  0x42   :  { %216 = vmatprep.subr.mxu0 %v322_v0 }
  0x43   :  { %217 = vmatpush3.msra.mxu0 %v60_v15 }
  0x44   :  { %218 = vmatprep.subr.mxu0 %v322_v0 }
  0x45   :  { %219 = vmatpush3.msra.mxu0 %v59_v17 }
  0x46   :  { %221 = vmatmul.mubr.msk.f32.vlgmr.msra.gmra.mxu0 %vm56_vm1, %v57_v18 }
 0x106   :  { %v148_v20 = vpop.f32.mrf.mxu0 }
 0x107   :  { %v149_v21 = vadd.f32 %v169_v19, %v148_v20 }
 0x108   :  { %v222_v22 = vpop.f32.mrf.mxu0 }
 0x109   :  { %152 = vst [vmem:[#allocation8] sm:$0xff] %v149_v21 }
 0x10a   :  { %302 = shalt.err (!%p299_p5)
}
 0x10b   :  { %162 = dma.vmem_to_hbm [thread:$0]  %s160_s6, 128, %s369_s4, [#allocation4]  }
 0x10c   :  { %315 = dma.done.wait [#allocation4], 128  }
 0x10d   :  { %316 = vsyncadd [#allocation4], 4294967168 }
 0x10e   :  { %166 = vsyncpa [#allocation3], 1 }
 0x10f   :  { %167 = vsyncpa [#allocation6], 1 }
 0x110   :  { %168 = vsyncpa [#allocation4], 1 }

</bundles_post_ra>
